<compile_context>
chip_gen: v7x
topology: tpu7x:2x2x1
jax: 0.10.0
libtpu: 0.0.40
codegen_flags: <defaults>
</compile_context>

<pallas_src>
import functools

import jax
import jax.numpy as jnp
from jax.experimental import pallas as pl
from jax.experimental.pallas import tpu as pltpu


# ----------------------------------------------------------------------------
# Pallas kernel: tiled bool -> int32 sum of the (0/1) execution grid
# ----------------------------------------------------------------------------
_LANES = 512                      # lane-dense last dim (multiple of 128)
_TILE_ELEMS = 2 * 1024 * 1024     # ~2 MiB of bool per block (v7x-friendly)
_TINY_MAX = 8192                  # below this, a (1, total) block is fine


def _grid_sum_kernel(x_ref, out_ref, acc_ref, *, n_tiles, sub, lanes, tail):
    # x_ref:   (sub, lanes) bool tile in VMEM
    # out_ref: (1, 1)       int32 in SMEM (written once, on the last step)
    # acc_ref: (1, lanes)   int32 VMEM accumulator, resident across the grid
    i = pl.program_id(0)

    @pl.when(i == 0)
    def _init():
        acc_ref[...] = jnp.zeros_like(acc_ref)

    def _accumulate(valid_rows):
        x = x_ref[...]                                     # bool, no HBM convert pass
        if valid_rows < sub:                               # static: ragged tail only
            row_id = jax.lax.broadcasted_iota(jnp.int32, (sub, lanes), 0)
            x = jnp.logical_and(x, row_id < valid_rows)    # zero the OOB garbage rows
        # widen only inside the sublane reduction; partial stays (1, lanes)
        acc_ref[...] += jnp.sum(x, axis=0, keepdims=True, dtype=jnp.int32)

    if tail == sub:                                        # rows divide evenly
        _accumulate(sub)
    else:
        @pl.when(i < n_tiles - 1)
        def _body():
            _accumulate(sub)

        @pl.when(i == n_tiles - 1)
        def _tail():
            _accumulate(tail)

    @pl.when(i == n_tiles - 1)
    def _finalize():
        # single cross-lane (XLU) reduce for the whole kernel
        out_ref[0, 0] = jnp.sum(acc_ref[...])


def pallas_grid_num_exec(grid_bool: jax.Array) -> jax.Array:
    """Returns grid.sum() as a device int32 scalar via a tiled Pallas reduction."""
    flat = grid_bool.reshape(-1)
    if flat.dtype != jnp.bool_:
        flat = flat != 0
    total = int(flat.size)                                  # static
    if total == 0:
        return jnp.int32(0)

    # Pick a lane-dense 2-D view without copying whenever possible.
    if total % _LANES == 0:
        lanes = _LANES
    elif total % 128 == 0:
        lanes = 128
    elif total <= _TINY_MAX:
        lanes = total            # (1, total): block == full dims, no (8,128) constraint
    else:
        # TODO(synk): non-lane-aligned large grids pay one extra HBM copy here.
        flat = jnp.pad(flat, (0, _LANES - total % _LANES))  # zero pad: sum unchanged
        lanes = _LANES
    rows = int(flat.size) // lanes
    x2d = flat.reshape(rows, lanes)

    sub_cap = max(32, _TILE_ELEMS // lanes)                 # multiple of 32 for 1-byte dtypes
    if rows <= sub_cap:
        sub, n_tiles, tail = rows, 1, rows                  # single full-dims block
    else:
        sub = sub_cap
        n_tiles = (rows + sub - 1) // sub
        tail = rows - (n_tiles - 1) * sub                   # masked in-kernel (no pad)

    kernel = functools.partial(
        _grid_sum_kernel, n_tiles=n_tiles, sub=sub, lanes=lanes, tail=tail)

    out = pl.pallas_call(
        kernel,
        out_shape=jax.ShapeDtypeStruct((1, 1), jnp.int32),
        grid_spec=pltpu.PrefetchScalarGridSpec(
            num_scalar_prefetch=0,
            grid=(n_tiles,),
            in_specs=[pl.BlockSpec((sub, lanes), lambda i: (i, 0))],
            out_specs=pl.BlockSpec(memory_space=pltpu.MemorySpace.SMEM),
            scratch_shapes=[pltpu.VMEM((1, lanes), jnp.int32)],
        ),
        compiler_params=pltpu.CompilerParams(
            dimension_semantics=("arbitrary",),              # reduction axis (resident acc)
            vmem_limit_bytes=32 * 1024 * 1024,
        ),
        # TODO(synk): on v7x (2 TensorCores) a leading "parallel" axis with
        # per-core partial sums would use both cores' HBM streams.
    )(x2d)
    return out[0, 0]                                         # int32 device scalar


# ----------------------------------------------------------------------------
# PolicyStats: tracks average number of executed blocks (device-lazy)
# ----------------------------------------------------------------------------
class PolicyStats:
    def __init__(self):
        self.count_images = 0
        self.exec = jnp.int32(0)      # accumulated on device, materialized when read
        self.total = 0

    def add_policy_meta(self, policy_meta: dict) -> dict:
        grid = policy_meta["grid"]                           # (N, 1, GH, GW) bool
        num_exec = pallas_grid_num_exec(grid)                # device int32 scalar
        num_total = int(grid.size)                           # static
        policy_meta["num_exec"] = num_exec                   # device (no host sync here)
        policy_meta["num_total"] = num_total
        policy_meta["perc_exec"] = num_exec.astype(jnp.float32) / num_total
        self.count_images += grid.shape[0]
        self.exec = self.exec + num_exec
        self.total += num_total
        return policy_meta

    def get_exec_percentage(self):
        # Only place where the exec count is pulled to the host.
        return float(self.exec) / self.total

    def __repr__(self) -> str:
        return (f"Policy stats: average exec percentage [0 - 1] : "
                f"{self.get_exec_percentage():0.3f}")


# ----------------------------------------------------------------------------
# Policy (abstract in torch; minimal concrete forward applying the shared
# machinery: optional exec-count quantization + stats accumulation)
# ----------------------------------------------------------------------------
class Policy:
    def __init__(self, block_size, verbose=False, quantize_number_exec=0):
        self.block_size = block_size
        self.net = None                # no trainable sub-network -> is_trainable() False
        self.optimizer = None
        self.verbose = verbose
        self.stats = PolicyStats()
        self.fp16_enabled = False
        self.quantize_number_exec = quantize_number_exec
        self._rng = jax.random.PRNGKey(0)

    def is_trainable(self):
        return self.net is not None

    def quantize_number_exec_grid(self, grid: jax.Array) -> jax.Array:
        """Static-shape, device-only version of the torch helper: rounds the number
        of executed blocks up to a multiple of quantize_number_exec * numel by
        flipping randomly chosen non-executed blocks.

        Edge case: if the rounded target exceeds the number of blocks the result
        saturates at all-ones (torch's random.sample would raise instead)."""
        if self.quantize_number_exec <= 0:
            return grid
        shape = grid.shape
        total = int(grid.size)                                   # static
        multiple = int(total * self.quantize_number_exec)        # static
        if multiple <= 0:
            return grid
        flat = grid.reshape(-1).astype(jnp.bool_)

        num_exec = pallas_grid_num_exec(flat)                    # device int32 scalar
        # floor division: for num_exec == 0, (num_exec - 1) // multiple == -1 -> rounded == 0
        num_exec_rounded = multiple * (1 + (num_exec - 1) // multiple)
        k = num_exec_rounded - num_exec                          # device scalar, 0 <= k < multiple

        # TODO(synk): torch uses host-side random.sample; here the random choice of
        # non-executed blocks comes from jax.random (same semantics, different RNG).
        self._rng, sub = jax.random.split(self._rng)
        # executed blocks get score -1 so the top_k picks non-executed blocks first;
        # `multiple` statically upper-bounds k, so no full argsort / full-size scatter.
        scores = jnp.where(flat, -1.0, jax.random.uniform(sub, (total,)))
        _, idx = jax.lax.top_k(scores, multiple)                 # random non-exec blocks
        flip = jnp.arange(multiple, dtype=jnp.int32) < k         # only first k are flipped
        updates = jnp.logical_or(flat[idx], flip)
        flat = flat.at[idx].set(updates)
        return flat.reshape(shape)

    def forward(self, policy_meta: dict) -> dict:
        grid = policy_meta["grid"]
        grid = self.quantize_number_exec_grid(grid)
        policy_meta["grid"] = grid
        policy_meta = self.stats.add_policy_meta(policy_meta)
        return policy_meta

    __call__ = forward

    def optim(self, policy_meta, train=True, **kwargs):
        return policy_meta


# ----------------------------------------------------------------------------
# main
# ----------------------------------------------------------------------------
if __name__ == "__main__":
    key = jax.random.PRNGKey(0)
    k1, k2 = jax.random.split(key)

    # Execution grid: batch=2, 1 channel, 16x16 block grid (NCHW, bool)
    N, GH, GW = 2, 16, 16
    grid = jax.random.bernoulli(k1, p=0.5, shape=(N, 1, GH, GW))

    # ---- plain path (quantize_number_exec = 0) ----
    policy = Policy(block_size=128, verbose=False, quantize_number_exec=0)
    policy_meta = {"grid": grid}
    policy_meta = policy(policy_meta)

    num_exec = int(jax.block_until_ready(policy_meta["num_exec"]))
    ref_num_exec = int(jnp.sum(grid))
    assert num_exec == ref_num_exec, (num_exec, ref_num_exec)
    assert policy_meta["num_total"] == N * GH * GW
    assert abs(float(policy_meta["perc_exec"]) - ref_num_exec / (N * GH * GW)) < 1e-6
    assert policy.stats.count_images == N
    assert abs(policy.stats.get_exec_percentage() - ref_num_exec / (N * GH * GW)) < 1e-6

    # ---- quantized path (exec count rounded up to a multiple of 0.25 * numel) ----
    policy_q = Policy(block_size=128, verbose=False, quantize_number_exec=0.25)
    meta_q = policy_q({"grid": grid})
    num_exec_q = int(jax.block_until_ready(meta_q["num_exec"]))
    multiple = int(N * GH * GW * 0.25)
    assert num_exec_q >= ref_num_exec
    assert num_exec_q % multiple == 0, (num_exec_q, multiple)
    assert num_exec_q == int(jnp.sum(meta_q["grid"]))

    # ---- exercise the tiled path (multi-block + in-kernel ragged-tail mask) ----
    big = jax.random.bernoulli(k2, p=0.3, shape=(1, 1, 4136, _LANES))   # 2 tiles, ragged tail
    big_sum = int(jax.block_until_ready(pallas_grid_num_exec(big)))
    ref_big = int(jnp.sum(big))
    assert big_sum == ref_big, (big_sum, ref_big)

    print("KERNEL_OK")
</pallas_src>

<mosaic_0001>
module attributes {stable_mosaic.version = 11 : i64} {
  func.func @_grid_sum_kernel(%arg0: i32, %arg1: memref<1x512xi32, #tpu.memory_space<vmem>>, %arg2: memref<1x1xi32, #tpu.memory_space<smem>>, %arg3: memref<1x512xi32, #tpu.memory_space<vmem>>) attributes {dimension_semantics = [#tpu.dimension_semantics<arbitrary>], iteration_bounds = array<i64: 1>, scalar_prefetch = 0 : i64, scratch_operands = 1 : i64, tpu.core_type = #tpu.core_type<tc>, window_params = [{transform_indices = @transform_0, window_bounds = array<i64: 1, 512>}, {transform_indices = @transform_1, window_bounds = array<i64: 1, 1>}]} {
    %c0_i32 = arith.constant 0 : i32
    %0 = arith.cmpi eq, %arg0, %c0_i32 : i32
    %1 = arith.extui %0 : i1 to i32
    %c0_i32_0 = arith.constant 0 : i32
    %2 = arith.cmpi ne, %1, %c0_i32_0 : i32
    scf.if %2 {
      %c0_i32_9 = arith.constant 0 : i32
      %14 = vector.broadcast %c0_i32_9 : i32 to vector<1x512xi32>
      %c0_10 = arith.constant 0 : index
      %c0_11 = arith.constant 0 : index
      %15 = vector.load %arg3[%c0_10, %c0_11] : memref<1x512xi32, #tpu.memory_space<vmem>>, vector<1x512xi32>
      tpu.vector_store %arg3[%c0_10, %c0_11], %14 {strides = array<i32>} : memref<1x512xi32, #tpu.memory_space<vmem>>, vector<1x512xi32>,
    } else {
    }
    %c0 = arith.constant 0 : index
    %c0_1 = arith.constant 0 : index
    %3 = vector.load %arg1[%c0, %c0_1] : memref<1x512xi32, #tpu.memory_space<vmem>>, vector<1x512xi32>
    %cst = arith.constant dense<0> : vector<1x512xi32>
    %4 = arith.cmpi ne, %3, %cst : vector<1x512xi32>
    %c0_2 = arith.constant 0 : index
    %c0_3 = arith.constant 0 : index
    %5 = vector.load %arg3[%c0_2, %c0_3] : memref<1x512xi32, #tpu.memory_space<vmem>>, vector<1x512xi32>
    %6 = arith.extui %4 : vector<1x512xi1> to vector<1x512xi32>
    %cst_4 = arith.constant dense<0> : vector<512xi32>
    %7 = vector.multi_reduction <add>, %6, %cst_4 [0] : vector<1x512xi32> to vector<512xi32>
    %8 = vector.shape_cast %7 : vector<512xi32> to vector<1x512xi32>
    %9 = arith.addi %5, %8 : vector<1x512xi32>
    %c0_5 = arith.constant 0 : index
    %c0_6 = arith.constant 0 : index
    %10 = vector.load %arg3[%c0_5, %c0_6] : memref<1x512xi32, #tpu.memory_space<vmem>>, vector<1x512xi32>
    tpu.vector_store %arg3[%c0_5, %c0_6], %9 {strides = array<i32>} : memref<1x512xi32, #tpu.memory_space<vmem>>, vector<1x512xi32>,
    %c0_i32_7 = arith.constant 0 : i32
    %11 = arith.cmpi eq, %arg0, %c0_i32_7 : i32
    %12 = arith.extui %11 : i1 to i32
    %c0_i32_8 = arith.constant 0 : i32
    %13 = arith.cmpi ne, %12, %c0_i32_8 : i32
    scf.if %13 {
      %c0_9 = arith.constant 0 : index
      %c0_10 = arith.constant 0 : index
      %14 = vector.load %arg3[%c0_9, %c0_10] : memref<1x512xi32, #tpu.memory_space<vmem>>, vector<1x512xi32>
      %15 = vector.shape_cast %14 : vector<1x512xi32> to vector<1x1x512xi32>
      %cst_11 = arith.constant dense<0> : vector<1xi32>
      %16 = vector.multi_reduction <add>, %15, %cst_11 [1, 2] : vector<1x1x512xi32> to vector<1xi32>
      %17 = vector.shape_cast %16 : vector<1xi32> to vector<1x1x1xi32>
      %18 = vector.extract %17[0, 0, 0] : i32 from vector<1x1x1xi32>
      %c0_12 = arith.constant 0 : index
      %c0_13 = arith.constant 0 : index
      %19 = memref.load %arg2[%c0_12, %c0_13] : memref<1x1xi32, #tpu.memory_space<smem>>
      memref.store %18, %arg2[%c0_12, %c0_13] : memref<1x1xi32, #tpu.memory_space<smem>>
    } else {
    }
    return
  }
  func.func @transform_0(%arg0: i32) -> (i32, i32) {
    %c0_i32 = arith.constant 0 : i32
    %c0_i32_0 = arith.constant 0 : i32
    return %arg0, %c0_i32 : i32, i32
  }
  func.func @transform_1(%arg0: i32) -> (i32, i32) {
    %c0_i32 = arith.constant 0 : i32
    %c0_i32_0 = arith.constant 0 : i32
    %c0_i32_1 = arith.constant 0 : i32
    return %c0_i32, %c0_i32_0 : i32, i32
  }
}

</mosaic_0001>

<bundles_post_ra>
// kernel: tpu_custom_call.1
= control target key start
LH: loop header
LB: loop body
LE: loop exit
PB: predicated region body
PF: predicated region fallthrough
CT: control target
= control target key end

     0   :  { %v13_v0 = vlaneseq  ;;  %s133_s0 = inlined_call_operand.vmem [shape: s32[1,512], index: 0, kind: input, shape index: {}]   ;;  %s134_s1 = inlined_call_operand.hbm [shape: s32[1,1], index: 1, kind: output, shape index: {}]  }
   0x1   :  { %6 = vsyncpa [#allocation4], 0  ;;  %v18_v1 = vld [vmem:[%s133_s0] sm:$0xf]  ;;  %v106_v2 = vmov 0   ;;  %vm48_vm2 = vcmask 1040384  }
   0x2   :  { %vm15_vm0 = vcmp.lt.s32.totalorder %v13_v0, 512  ;;  %vm19_vm1 = vcmp.ne.s32.totalorder %v18_v1, 0  ;;  %v33_v6 = vshrl.u32 %v13_v0, 7  ;;  %s94_s10 = scalar_lea.hbm %s134_s1, 16 }
   0x3   :  { %17 = vst.msk [vmem:[#allocation2] sm:$0xf] %vm15_vm0, %v106_v2  ;;  %v21_v3 = vsel %vm19_vm1, 1, %v106_v2  ;;  %p95_p0 = scmp.ne.s32.totalorder %s134_s1, %s94_s10  ;;  %p98_p1 = scmp.lt.u32.totalorder %s94_s10, %s134_s1 }
   0x4   :  { %v34_v7 = vsub.s32 0, %v33_v6  ;;  %v38_v8 = vsub.s32 1, %v33_v6  ;;  %v42_v9 = vsub.s32 2, %v33_v6  ;;  %v46_v10 = vsub.s32 3, %v33_v6 }
   0x5   :  { %p100_p2 = pnand %p98_p1, %p95_p0 }
   0xa   :  { %v20_v4 = vld [vmem:[#allocation2] sm:$0xf] }
   0xb   :  { %v22_v5 = vadd.s32 %v21_v3, %v20_v4 }
   0xd   :  { %27 = vst.msk [vmem:[#allocation2] sm:$0xf] %vm15_vm0, %v22_v5 }
  0x14   :  { %v31_v11 = vld [vmem:[#allocation2] sm:$0xf] }
  0x15   :  { %v35_v12 = vrot.slane %v31_v11, %v34_v7  ;;  %v39_v13 = vrot.slane %v31_v11, %v38_v8  ;;  %v43_v14 = vrot.slane %v31_v11, %v42_v9  ;;  %v47_v15 = vrot.slane %v31_v11, %v46_v10 }
  0x17   :  { %v49_v16 = vsel %vm48_vm2, %v35_v12, 0  ;;  %v50_v17 = vsel %vm48_vm2, %v39_v13, 0  ;;  %v51_v18 = vsel %vm48_vm2, %v43_v14, 0  ;;  %v52_v19 = vsel %vm48_vm2, %v47_v15, 0 }
  0x18   :  { %v53_v20 = vadd.s32 %v50_v17, %v49_v16  ;;  %v54_v21 = vadd.s32 %v52_v19, %v51_v18 }
  0x1a   :  { %v55_v22 = vadd.s32 %v54_v21, %v53_v20 }
  0x1c   :  { %v57_v23 = vshrl.u32 %v55_v22, 16  ;;  %v56_v24 = vand.u32 65535, %v55_v22 }
  0x1e   :  { %v59_v25 = vcvt.s32.f32 %v57_v23  ;;  %v58_v26 = vcvt.s32.f32 %v56_v24 }
  0x20   :  { %62 = vadd.xlane.f32.xlu0 %v59_v25 }
  0x24   :  { %60 = vadd.xlane.f32.xlu0 %v58_v26 }
  0xad   :  { %v63_v27 = vpop.xlane.xlu0 %62 }
  0xae   :  { %v65_v28 = vcvt.f32.s32 %v63_v27 }
  0xb0   :  { %v66_v30 = vshll.u32 %v65_v28, 16 }
  0xb1   :  { %v61_v29 = vpop.xlane.xlu0 %60 }
  0xb2   :  { %v64_v31 = vcvt.f32.s32 %v61_v29 }
  0xb4   :  { %v67_v32 = vadd.s32 %v66_v30, %v64_v31 }
  0xb6   :  { %v68_v33 = vrot.slane %v67_v32, 4 }
  0xb8   :  { %v69_v34 = vadd.s32 %v68_v33, %v67_v32 }
  0xba   :  { %v70_v35 = vrot.slane %v69_v34, 2 }
  0xbc   :  { %v71_v36 = vadd.s32 %v70_v35, %v69_v34 }
  0xbe   :  { %v72_v37 = vrot.slane %v71_v36, 1 }
  0xc0   :  { %v73_v38 = vadd.s32 %v72_v37, %v71_v36 }
  0xc2   :  { %90 = vpush %v73_v38 }
  0xf3   :  { %s91_s0 = spop %90 }
  0xf4   :  { %76 = sst [smem:[#allocation3]] %s91_s0 }
  0xf5   :  { %103 = shalt.err (!%p100_p2)
}
  0xf6   :  { %s107_s15 = smov [#allocation3]  }
  0xf7   :  { %84 = dma.smem_to_hbm %s107_s15, 16, %s134_s1, [#allocation4]  }
  0xf8   :  { %104 = dma.done.wait [#allocation4], 16  }
  0xf9   :  { %105 = vsyncadd [#allocation4], 4294967280 }
  0xfa   :  { %88 = sfence }
  0xfb   :  { %89 = vsyncpa [#allocation4], 1 }

</bundles_post_ra>
